<compile_context>
chip_gen: v7x
topology: tpu7x:2x2x1
jax: 0.10.0
libtpu: 0.0.40
codegen_flags: <defaults>
</compile_context>

<pallas_src>
import jax
import jax.numpy as jnp
from jax.experimental import pallas as pl
from jax.experimental.pallas import tpu as pltpu

LANE = 128
_SUBLANE_BY_ITEMSIZE = {4: 8, 2: 16, 1: 32}
_BUFFERED = getattr(pl, "Buffered", None)


def _round_up(x, m):
    return (x + m - 1) // m * m


def _cdiv(a, b):
    return -(-a // b)


def _vmem_capacity_bytes():
    try:
        return int(pltpu.get_tpu_info().vmem_capacity_bytes)
    except Exception:
        return 64 << 20  # conservative (v7x per-TC physical VMEM)


def _tensorcores_per_chip():
    try:
        info = pltpu.get_tpu_info()
        for name in ("tensorcores_per_chip", "num_tensorcores", "num_cores",
                     "core_count"):
            v = getattr(info, name, None)
            if isinstance(v, int) and v > 0:
                return v
    except Exception:
        pass
    return 1  # v5e / v6e: one TensorCore per chip


def _const_block(shape, single_buffer):
    """Whole-array block with a constant index_map -> resident across the grid."""
    zeros = (0,) * len(shape)
    idx = lambda i, z=zeros: z
    if single_buffer and _BUFFERED is not None:
        try:
            # Never changes across grid steps -> one buffer is enough.
            return pl.BlockSpec(shape, idx, pipeline_mode=pl.Buffered(1))
        except TypeError:
            pass
    return pl.BlockSpec(shape, idx)


def _x_block(tb_eff, in_features, x_buffers):
    idx = lambda i: (i, 0)
    if x_buffers != 2 and _BUFFERED is not None:
        try:
            return pl.BlockSpec((tb_eff, in_features), idx,
                                pipeline_mode=pl.Buffered(x_buffers))
        except TypeError:
            pass
    return pl.BlockSpec((tb_eff, in_features), idx)


def _auto_batch_tile(in_features, nc_pad, x_itemsize, out_itemsize,
                     weight_bytes, sub, x_buffers, vmem_cap):
    # Budget ~60% of physical VMEM; assume worst-case double-buffered weights.
    budget = int(0.6 * vmem_cap) - 2 * weight_bytes
    per_row = (x_buffers * in_features * x_itemsize          # pipelined x tile
               + 2 * nc_pad * out_itemsize                   # pipelined out tile
               + 4 * (128 + 64 + 32 + nc_pad))               # f32 intermediates
    tb = budget // max(per_row, 1)
    return int(max(sub, min(tb, 1024)))


def teacher_kernel(x_ref, w1_ref, b1_ref, w2_ref, b2_ref,
                   w3_ref, b3_ref, w4_ref, b4_ref, o_ref):
    # Cast x in-kernel (avoids a wrapper-side astype pass over x in HBM).
    x = x_ref[...].astype(w1_ref.dtype)
    # fc1 + relu (MXU matmul, f32 accumulation; bias/ReLU on the VPU in f32)
    h = jnp.dot(x, w1_ref[...], preferred_element_type=jnp.float32)
    h = jnp.maximum(h + b1_ref[...], 0.0)
    # fc2 + relu
    h = jnp.dot(h.astype(w2_ref.dtype), w2_ref[...],
                preferred_element_type=jnp.float32)
    h = jnp.maximum(h + b2_ref[...], 0.0)
    # fc3 + relu
    h = jnp.dot(h.astype(w3_ref.dtype), w3_ref[...],
                preferred_element_type=jnp.float32)
    h = jnp.maximum(h + b3_ref[...], 0.0)
    # out (no activation); lane-dense (class axis padded to 128) store
    o = jnp.dot(h.astype(w4_ref.dtype), w4_ref[...],
                preferred_element_type=jnp.float32)
    o_ref[...] = (o + b4_ref[...]).astype(o_ref.dtype)


def _forward_impl(x, params, *, tb, out_dtype, x_buffers, single_buffer_weights):
    B, in_features = x.shape
    num_classes = params["w4"].shape[1]
    out_dtype = jnp.dtype(out_dtype if out_dtype is not None else x.dtype)

    # ---- lane-dense output: pad the class axis to a multiple of 128 ----------
    nc_pad = _round_up(max(num_classes, LANE), LANE)
    w4, b4 = params["w4"], params["b4"]
    if nc_pad != num_classes:
        w4 = jnp.pad(w4, ((0, 0), (0, nc_pad - num_classes)))
        b4 = jnp.pad(b4, ((0, 0), (0, nc_pad - num_classes)))
    w1, w2, w3 = params["w1"], params["w2"], params["w3"]
    b1, b2, b3 = params["b1"], params["b2"], params["b3"]
    weights = (w1, b1, w2, b2, w3, b3, w4, b4)
    weight_bytes = sum(int(a.size) * a.dtype.itemsize for a in weights)

    # ---- hardware-aware tiling ------------------------------------------------
    sub = _SUBLANE_BY_ITEMSIZE.get(x.dtype.itemsize, 8)
    n_cores = _tensorcores_per_chip()
    vmem_cap = _vmem_capacity_bytes()
    if tb is None:
        tb = _auto_batch_tile(in_features, nc_pad, x.dtype.itemsize,
                              out_dtype.itemsize, weight_bytes, sub,
                              x_buffers, vmem_cap)
    tb_eff = max(sub, (min(int(tb), _round_up(B, sub)) // sub) * sub)
    if B <= tb_eff:
        if n_cores >= 2 and B >= 4 * sub:
            # Only split into >=2 steps when the chip has 2 TensorCores (v7x);
            # on v5e/v6e the grid is a serial loop and splitting is pure overhead.
            tb_eff = _round_up(_cdiv(B, 2), sub)
        else:
            tb_eff = B  # exact single tile: no padding, no masked tail
    grid = (_cdiv(B, tb_eff),)
    # Partial last tile (when tb_eff does not divide B) is handled by Pallas:
    # OOB rows of the load are junk but rows are independent, and OOB stores
    # are dropped -- no wrapper-side pad of x required.

    # ---- specs ----------------------------------------------------------------
    in_specs = [_x_block(tb_eff, in_features, x_buffers)]
    in_specs += [_const_block(a.shape, single_buffer_weights) for a in weights]
    out_spec = pl.BlockSpec((tb_eff, nc_pad), lambda i: (i, 0))

    # ---- VMEM limit (explicit, with headroom against the physical capacity) ---
    w_bufs = 1 if single_buffer_weights else 2
    est = (w_bufs * weight_bytes
           + x_buffers * tb_eff * in_features * x.dtype.itemsize
           + 2 * tb_eff * nc_pad * out_dtype.itemsize
           + (2 << 20))
    vmem_limit = int(min(0.9 * vmem_cap, max(32 << 20, 2 * est)))

    # ---- scheduler hint (derived from actual layer shapes) --------------------
    flops = 2 * B * (in_features * w1.shape[1]
                     + w1.shape[1] * w2.shape[1]
                     + w2.shape[1] * w3.shape[1]
                     + w3.shape[1] * nc_pad)
    bytes_accessed = (int(x.size) * x.dtype.itemsize + weight_bytes
                      + B * nc_pad * out_dtype.itemsize)
    cost = pl.CostEstimate(flops=flops, transcendentals=0,
                           bytes_accessed=bytes_accessed)

    out_padded = pl.pallas_call(
        teacher_kernel,
        out_shape=jax.ShapeDtypeStruct((B, nc_pad), out_dtype),
        grid_spec=pl.GridSpec(grid=grid, in_specs=in_specs, out_specs=out_spec),
        compiler_params=pltpu.CompilerParams(
            dimension_semantics=("parallel",),
            vmem_limit_bytes=vmem_limit),
        cost_estimate=cost,
    )(x, *weights)

    # TODO(synk): a fused consumer (argmax / softmax-CE) could take the padded
    # (B, nc_pad) slab directly and skip this slice + the padded writeback.
    return out_padded[:, :num_classes]


def teacher_forward(x, params, *, tb=None, out_dtype=None, x_buffers=2):
    """x: (B, input_size). params: dict of (in, out) weights + (1, out) f32 biases.

    Weights may be bf16 (recommended: halves weight DMA bytes, MXU accumulates
    in f32, biases/ReLU stay f32) or f32. Output dtype defaults to x.dtype.
    """
    try:
        return _forward_impl(x, params, tb=tb, out_dtype=out_dtype,
                             x_buffers=x_buffers, single_buffer_weights=True)
    except Exception:
        # TODO(synk): pipeline_mode=pl.Buffered(1) rejected by this jax/Mosaic;
        # fall back to default double-buffered weight blocks.
        return _forward_impl(x, params, tb=tb, out_dtype=out_dtype,
                             x_buffers=x_buffers, single_buffer_weights=False)


def init_params(key, input_size, num_classes, dtype=jnp.bfloat16):
    """PyTorch-Linear-like uniform fan-in init. Weights stored as (in, out)
    (i.e. W.T of torch's (out, in)); biases kept f32 for the f32 epilogue."""
    dims = [(input_size, 128), (128, 64), (64, 32), (32, num_classes)]
    params = {}
    for idx, (fan_in, fan_out) in enumerate(dims, start=1):
        key, kw, kb = jax.random.split(key, 3)
        bound = 1.0 / float(fan_in) ** 0.5
        params[f"w{idx}"] = jax.random.uniform(
            kw, (fan_in, fan_out), jnp.float32, -bound, bound).astype(dtype)
        params[f"b{idx}"] = jax.random.uniform(
            kb, (1, fan_out), jnp.float32, -bound, bound)
    return params


def teacher_ref(x, params):
    f32 = jnp.float32
    h = x.astype(f32)
    for i in (1, 2, 3):
        h = jnp.maximum(h @ params[f"w{i}"].astype(f32) + params[f"b{i}"], 0.0)
    return h @ params["w4"].astype(f32) + params["b4"]


if __name__ == "__main__":
    input_size, num_classes = 32, 10
    key = jax.random.PRNGKey(0)

    # f32 params for a bit-tight check, bf16 params for the default fast path.
    params_f32 = init_params(key, input_size, num_classes, dtype=jnp.float32)
    params_bf16 = dict(params_f32)
    for k in ("w1", "w2", "w3", "w4"):
        params_bf16[k] = params_f32[k].astype(jnp.bfloat16)

    # (batch, tb): single tile, larger single tile, and a multi-step grid with a
    # partial (masked) last tile.
    for batch, tb in ((8, None), (24, None), (20, 8)):
        key, kx = jax.random.split(key)
        x = jax.random.normal(kx, (batch, input_size), jnp.float32)

        # f32 path: exact match against the pure-JAX reference.
        out = jax.block_until_ready(teacher_forward(x, params_f32, tb=tb))
        ref = teacher_ref(x, params_f32)
        assert out.shape == (batch, num_classes)
        assert out.dtype == jnp.float32
        assert jnp.allclose(out, ref, atol=1e-5, rtol=1e-5), (
            f"f32 mismatch at batch={batch}, tb={tb}")

        # bf16 weights (default deployment dtype): looser tolerance.
        out_bf = jax.block_until_ready(teacher_forward(x, params_bf16, tb=tb))
        ref_bf = teacher_ref(x, params_bf16)
        assert out_bf.shape == (batch, num_classes)
        assert jnp.allclose(out_bf, ref_bf, atol=5e-2, rtol=5e-2), (
            f"bf16 mismatch at batch={batch}, tb={tb}")

    print("KERNEL_OK")
</pallas_src>

<mosaic_0001>
module attributes {stable_mosaic.version = 11 : i64} {
  func.func @teacher_kernel(%arg0: i32, %arg1: memref<8x32xf32, #tpu.memory_space<vmem>>, %arg2: memref<32x128xf32, #tpu.memory_space<vmem>>, %arg3: memref<1x128xf32, #tpu.memory_space<vmem>>, %arg4: memref<128x64xf32, #tpu.memory_space<vmem>>, %arg5: memref<1x64xf32, #tpu.memory_space<vmem>>, %arg6: memref<64x32xf32, #tpu.memory_space<vmem>>, %arg7: memref<1x32xf32, #tpu.memory_space<vmem>>, %arg8: memref<32x128xf32, #tpu.memory_space<vmem>>, %arg9: memref<1x128xf32, #tpu.memory_space<vmem>>, %arg10: memref<8x128xf32, #tpu.memory_space<vmem>>) attributes {dimension_semantics = [#tpu.dimension_semantics<parallel>], iteration_bounds = array<i64: 1>, scalar_prefetch = 0 : i64, scratch_operands = 0 : i64, tpu.core_type = #tpu.core_type<tc>, window_params = [{transform_indices = @transform_0, window_bounds = array<i64: 8, 32>}, {pipeline_mode = #tpu.pipeline_mode<synchronous>, transform_indices = @transform_1, window_bounds = array<i64: 32, 128>}, {pipeline_mode = #tpu.pipeline_mode<synchronous>, transform_indices = @transform_2, window_bounds = array<i64: 1, 128>}, {pipeline_mode = #tpu.pipeline_mode<synchronous>, transform_indices = @transform_3, window_bounds = array<i64: 128, 64>}, {pipeline_mode = #tpu.pipeline_mode<synchronous>, transform_indices = @transform_4, window_bounds = array<i64: 1, 64>}, {pipeline_mode = #tpu.pipeline_mode<synchronous>, transform_indices = @transform_5, window_bounds = array<i64: 64, 32>}, {pipeline_mode = #tpu.pipeline_mode<synchronous>, transform_indices = @transform_6, window_bounds = array<i64: 1, 32>}, {pipeline_mode = #tpu.pipeline_mode<synchronous>, transform_indices = @transform_7, window_bounds = array<i64: 32, 128>}, {pipeline_mode = #tpu.pipeline_mode<synchronous>, transform_indices = @transform_8, window_bounds = array<i64: 1, 128>}, {transform_indices = @transform_9, window_bounds = array<i64: 8, 128>}]} {
    %c0 = arith.constant 0 : index
    %c0_0 = arith.constant 0 : index
    %0 = vector.load %arg1[%c0, %c0_0] : memref<8x32xf32, #tpu.memory_space<vmem>>, vector<8x32xf32>
    %c0_1 = arith.constant 0 : index
    %c0_2 = arith.constant 0 : index
    %1 = vector.load %arg2[%c0_1, %c0_2] : memref<32x128xf32, #tpu.memory_space<vmem>>, vector<32x128xf32>
    %cst = arith.constant dense<0.000000e+00> : vector<8x128xf32>
    %2 = tpu.matmul %0, %1, %cst {dimension_numbers = #tpu.dot_dimension_numbers<[1], [0], [0], [1], [0, 0, 1, 1], [], []>} : vector<8x32xf32>, vector<32x128xf32>, vector<8x128xf32> -> vector<8x128xf32>
    %c0_3 = arith.constant 0 : index
    %c0_4 = arith.constant 0 : index
    %3 = vector.load %arg3[%c0_3, %c0_4] : memref<1x128xf32, #tpu.memory_space<vmem>>, vector<1x128xf32>
    %4 = vector.broadcast %3 : vector<1x128xf32> to vector<8x128xf32>
    %5 = arith.addf %2, %4 : vector<8x128xf32>
    %cst_5 = arith.constant 0.000000e+00 : f32
    %6 = vector.broadcast %cst_5 : f32 to vector<8x128xf32>
    %7 = arith.maximumf %5, %6 : vector<8x128xf32>
    %c0_6 = arith.constant 0 : index
    %c0_7 = arith.constant 0 : index
    %8 = vector.load %arg4[%c0_6, %c0_7] : memref<128x64xf32, #tpu.memory_space<vmem>>, vector<128x64xf32>
    %cst_8 = arith.constant dense<0.000000e+00> : vector<8x64xf32>
    %9 = tpu.matmul %7, %8, %cst_8 {dimension_numbers = #tpu.dot_dimension_numbers<[1], [0], [0], [1], [0, 0, 1, 1], [], []>} : vector<8x128xf32>, vector<128x64xf32>, vector<8x64xf32> -> vector<8x64xf32>
    %c0_9 = arith.constant 0 : index
    %c0_10 = arith.constant 0 : index
    %10 = vector.load %arg5[%c0_9, %c0_10] : memref<1x64xf32, #tpu.memory_space<vmem>>, vector<1x64xf32>
    %11 = vector.broadcast %10 : vector<1x64xf32> to vector<8x64xf32>
    %12 = arith.addf %9, %11 : vector<8x64xf32>
    %cst_11 = arith.constant 0.000000e+00 : f32
    %13 = vector.broadcast %cst_11 : f32 to vector<8x64xf32>
    %14 = arith.maximumf %12, %13 : vector<8x64xf32>
    %c0_12 = arith.constant 0 : index
    %c0_13 = arith.constant 0 : index
    %15 = vector.load %arg6[%c0_12, %c0_13] : memref<64x32xf32, #tpu.memory_space<vmem>>, vector<64x32xf32>
    %cst_14 = arith.constant dense<0.000000e+00> : vector<8x32xf32>
    %16 = tpu.matmul %14, %15, %cst_14 {dimension_numbers = #tpu.dot_dimension_numbers<[1], [0], [0], [1], [0, 0, 1, 1], [], []>} : vector<8x64xf32>, vector<64x32xf32>, vector<8x32xf32> -> vector<8x32xf32>
    %c0_15 = arith.constant 0 : index
    %c0_16 = arith.constant 0 : index
    %17 = vector.load %arg7[%c0_15, %c0_16] : memref<1x32xf32, #tpu.memory_space<vmem>>, vector<1x32xf32>
    %18 = vector.broadcast %17 : vector<1x32xf32> to vector<8x32xf32>
    %19 = arith.addf %16, %18 : vector<8x32xf32>
    %cst_17 = arith.constant 0.000000e+00 : f32
    %20 = vector.broadcast %cst_17 : f32 to vector<8x32xf32>
    %21 = arith.maximumf %19, %20 : vector<8x32xf32>
    %c0_18 = arith.constant 0 : index
    %c0_19 = arith.constant 0 : index
    %22 = vector.load %arg8[%c0_18, %c0_19] : memref<32x128xf32, #tpu.memory_space<vmem>>, vector<32x128xf32>
    %cst_20 = arith.constant dense<0.000000e+00> : vector<8x128xf32>
    %23 = tpu.matmul %21, %22, %cst_20 {dimension_numbers = #tpu.dot_dimension_numbers<[1], [0], [0], [1], [0, 0, 1, 1], [], []>} : vector<8x32xf32>, vector<32x128xf32>, vector<8x128xf32> -> vector<8x128xf32>
    %c0_21 = arith.constant 0 : index
    %c0_22 = arith.constant 0 : index
    %24 = vector.load %arg9[%c0_21, %c0_22] : memref<1x128xf32, #tpu.memory_space<vmem>>, vector<1x128xf32>
    %25 = vector.broadcast %24 : vector<1x128xf32> to vector<8x128xf32>
    %26 = arith.addf %23, %25 : vector<8x128xf32>
    %c0_23 = arith.constant 0 : index
    %c0_24 = arith.constant 0 : index
    %27 = vector.load %arg10[%c0_23, %c0_24] : memref<8x128xf32, #tpu.memory_space<vmem>>, vector<8x128xf32>
    tpu.vector_store %arg10[%c0_23, %c0_24], %26 {strides = array<i32>} : memref<8x128xf32, #tpu.memory_space<vmem>>, vector<8x128xf32>,
    return
  }
  func.func @transform_0(%arg0: i32) -> (i32, i32) {
    %c0_i32 = arith.constant 0 : i32
    %c0_i32_0 = arith.constant 0 : i32
    return %arg0, %c0_i32 : i32, i32
  }
  func.func @transform_1(%arg0: i32) -> (i32, i32) {
    %c0_i32 = arith.constant 0 : i32
    %c0_i32_0 = arith.constant 0 : i32
    %c0_i32_1 = arith.constant 0 : i32
    return %c0_i32, %c0_i32_0 : i32, i32
  }
  func.func @transform_2(%arg0: i32) -> (i32, i32) {
    %c0_i32 = arith.constant 0 : i32
    %c0_i32_0 = arith.constant 0 : i32
    %c0_i32_1 = arith.constant 0 : i32
    return %c0_i32, %c0_i32_0 : i32, i32
  }
  func.func @transform_3(%arg0: i32) -> (i32, i32) {
    %c0_i32 = arith.constant 0 : i32
    %c0_i32_0 = arith.constant 0 : i32
    %c0_i32_1 = arith.constant 0 : i32
    return %c0_i32, %c0_i32_0 : i32, i32
  }
  func.func @transform_4(%arg0: i32) -> (i32, i32) {
    %c0_i32 = arith.constant 0 : i32
    %c0_i32_0 = arith.constant 0 : i32
    %c0_i32_1 = arith.constant 0 : i32
    return %c0_i32, %c0_i32_0 : i32, i32
  }
  func.func @transform_5(%arg0: i32) -> (i32, i32) {
    %c0_i32 = arith.constant 0 : i32
    %c0_i32_0 = arith.constant 0 : i32
    %c0_i32_1 = arith.constant 0 : i32
    return %c0_i32, %c0_i32_0 : i32, i32
  }
  func.func @transform_6(%arg0: i32) -> (i32, i32) {
    %c0_i32 = arith.constant 0 : i32
    %c0_i32_0 = arith.constant 0 : i32
    %c0_i32_1 = arith.constant 0 : i32
    return %c0_i32, %c0_i32_0 : i32, i32
  }
  func.func @transform_7(%arg0: i32) -> (i32, i32) {
    %c0_i32 = arith.constant 0 : i32
    %c0_i32_0 = arith.constant 0 : i32
    %c0_i32_1 = arith.constant 0 : i32
    return %c0_i32, %c0_i32_0 : i32, i32
  }
  func.func @transform_8(%arg0: i32) -> (i32, i32) {
    %c0_i32 = arith.constant 0 : i32
    %c0_i32_0 = arith.constant 0 : i32
    %c0_i32_1 = arith.constant 0 : i32
    return %c0_i32, %c0_i32_0 : i32, i32
  }
  func.func @transform_9(%arg0: i32) -> (i32, i32) {
    %c0_i32 = arith.constant 0 : i32
    %c0_i32_0 = arith.constant 0 : i32
    return %arg0, %c0_i32 : i32, i32
  }
}

module attributes {stable_mosaic.version = 11 : i64} {
  func.func @teacher_kernel(%arg0: i32, %arg1: memref<8x32xf32, #tpu.memory_space<vmem>>, %arg2: memref<32x128xf32, #tpu.memory_space<vmem>>, %arg3: memref<1x128xf32, #tpu.memory_space<vmem>>, %arg4: memref<128x64xf32, #tpu.memory_space<vmem>>, %arg5: memref<1x64xf32, #tpu.memory_space<vmem>>, %arg6: memref<64x32xf32, #tpu.memory_space<vmem>>, %arg7: memref<1x32xf32, #tpu.memory_space<vmem>>, %arg8: memref<32x128xf32, #tpu.memory_space<vmem>>, %arg9: memref<1x128xf32, #tpu.memory_space<vmem>>, %arg10: memref<8x128xf32, #tpu.memory_space<vmem>>) attributes {dimension_semantics = [#tpu.dimension_semantics<parallel>], iteration_bounds = array<i64: 1>, scalar_prefetch = 0 : i64, scratch_operands = 0 : i64, tpu.core_type = #tpu.core_type<tc>, window_params = [{transform_indices = @transform_0, window_bounds = array<i64: 8, 32>}, {pipeline_mode = #tpu.pipeline_mode<synchronous>, transform_indices = @transform_1, window_bounds = array<i64: 32, 128>}, {pipeline_mode = #tpu.pipeline_mode<synchronous>, transform_indices = @transform_2, window_bounds = array<i64: 1, 128>}, {pipeline_mode = #tpu.pipeline_mode<synchronous>, transform_indices = @transform_3, window_bounds = array<i64: 128, 64>}, {pipeline_mode = #tpu.pipeline_mode<synchronous>, transform_indices = @transform_4, window_bounds = array<i64: 1, 64>}, {pipeline_mode = #tpu.pipeline_mode<synchronous>, transform_indices = @transform_5, window_bounds = array<i64: 64, 32>}, {pipeline_mode = #tpu.pipeline_mode<synchronous>, transform_indices = @transform_6, window_bounds = array<i64: 1, 32>}, {pipeline_mode = #tpu.pipeline_mode<synchronous>, transform_indices = @transform_7, window_bounds = array<i64: 32, 128>}, {pipeline_mode = #tpu.pipeline_mode<synchronous>, transform_indices = @transform_8, window_bounds = array<i64: 1, 128>}, {transform_indices = @transform_9, window_bounds = array<i64: 8, 128>}]} {
    %c0 = arith.constant 0 : index
    %c0_0 = arith.constant 0 : index
    %0 = vector.load %arg1[%c0, %c0_0] : memref<8x32xf32, #tpu.memory_space<vmem>>, vector<8x32xf32>
    %c0_1 = arith.constant 0 : index
    %c0_2 = arith.constant 0 : index
    %1 = vector.load %arg2[%c0_1, %c0_2] : memref<32x128xf32, #tpu.memory_space<vmem>>, vector<32x128xf32>
    %cst = arith.constant dense<0.000000e+00> : vector<8x128xf32>
    %2 = tpu.matmul %0, %1, %cst {dimension_numbers = #tpu.dot_dimension_numbers<[1], [0], [0], [1], [0, 0, 1, 1], [], []>} : vector<8x32xf32>, vector<32x128xf32>, vector<8x128xf32> -> vector<8x128xf32>
    %c0_3 = arith.constant 0 : index
    %c0_4 = arith.constant 0 : index
    %3 = vector.load %arg3[%c0_3, %c0_4] : memref<1x128xf32, #tpu.memory_space<vmem>>, vector<1x128xf32>
    %4 = vector.broadcast %3 : vector<1x128xf32> to vector<8x128xf32>
    %5 = arith.addf %2, %4 : vector<8x128xf32>
    %cst_5 = arith.constant 0.000000e+00 : f32
    %6 = vector.broadcast %cst_5 : f32 to vector<8x128xf32>
    %7 = arith.maximumf %5, %6 : vector<8x128xf32>
    %c0_6 = arith.constant 0 : index
    %c0_7 = arith.constant 0 : index
    %8 = vector.load %arg4[%c0_6, %c0_7] : memref<128x64xf32, #tpu.memory_space<vmem>>, vector<128x64xf32>
    %cst_8 = arith.constant dense<0.000000e+00> : vector<8x64xf32>
    %9 = tpu.matmul %7, %8, %cst_8 {dimension_numbers = #tpu.dot_dimension_numbers<[1], [0], [0], [1], [0, 0, 1, 1], [], []>} : vector<8x128xf32>, vector<128x64xf32>, vector<8x64xf32> -> vector<8x64xf32>
    %c0_9 = arith.constant 0 : index
    %c0_10 = arith.constant 0 : index
    %10 = vector.load %arg5[%c0_9, %c0_10] : memref<1x64xf32, #tpu.memory_space<vmem>>, vector<1x64xf32>
    %11 = vector.broadcast %10 : vector<1x64xf32> to vector<8x64xf32>
    %12 = arith.addf %9, %11 : vector<8x64xf32>
    %cst_11 = arith.constant 0.000000e+00 : f32
    %13 = vector.broadcast %cst_11 : f32 to vector<8x64xf32>
    %14 = arith.maximumf %12, %13 : vector<8x64xf32>
    %c0_12 = arith.constant 0 : index
    %c0_13 = arith.constant 0 : index
    %15 = vector.load %arg6[%c0_12, %c0_13] : memref<64x32xf32, #tpu.memory_space<vmem>>, vector<64x32xf32>
    %cst_14 = arith.constant dense<0.000000e+00> : vector<8x32xf32>
    %16 = tpu.matmul %14, %15, %cst_14 {dimension_numbers = #tpu.dot_dimension_numbers<[1], [0], [0], [1], [0, 0, 1, 1], [], []>} : vector<8x64xf32>, vector<64x32xf32>, vector<8x32xf32> -> vector<8x32xf32>
    %c0_15 = arith.constant 0 : index
    %c0_16 = arith.constant 0 : index
    %17 = vector.load %arg7[%c0_15, %c0_16] : memref<1x32xf32, #tpu.memory_space<vmem>>, vector<1x32xf32>
    %18 = vector.broadcast %17 : vector<1x32xf32> to vector<8x32xf32>
    %19 = arith.addf %16, %18 : vector<8x32xf32>
    %cst_17 = arith.constant 0.000000e+00 : f32
    %20 = vector.broadcast %cst_17 : f32 to vector<8x32xf32>
    %21 = arith.maximumf %19, %20 : vector<8x32xf32>
    %c0_18 = arith.constant 0 : index
    %c0_19 = arith.constant 0 : index
    %22 = vector.load %arg8[%c0_18, %c0_19] : memref<32x128xf32, #tpu.memory_space<vmem>>, vector<32x128xf32>
    %cst_20 = arith.constant dense<0.000000e+00> : vector<8x128xf32>
    %23 = tpu.matmul %21, %22, %cst_20 {dimension_numbers = #tpu.dot_dimension_numbers<[1], [0], [0], [1], [0, 0, 1, 1], [], []>} : vector<8x32xf32>, vector<32x128xf32>, vector<8x128xf32> -> vector<8x128xf32>
    %c0_21 = arith.constant 0 : index
    %c0_22 = arith.constant 0 : index
    %24 = vector.load %arg9[%c0_21, %c0_22] : memref<1x128xf32, #tpu.memory_space<vmem>>, vector<1x128xf32>
    %25 = vector.broadcast %24 : vector<1x128xf32> to vector<8x128xf32>
    %26 = arith.addf %23, %25 : vector<8x128xf32>
    %c0_23 = arith.constant 0 : index
    %c0_24 = arith.constant 0 : index
    %27 = vector.load %arg10[%c0_23, %c0_24] : memref<8x128xf32, #tpu.memory_space<vmem>>, vector<8x128xf32>
    tpu.vector_store %arg10[%c0_23, %c0_24], %26 {strides = array<i32>} : memref<8x128xf32, #tpu.memory_space<vmem>>, vector<8x128xf32>,
    return
  }
  func.func @transform_0(%arg0: i32) -> (i32, i32) {
    %c0_i32 = arith.constant 0 : i32
    %c0_i32_0 = arith.constant 0 : i32
    return %arg0, %c0_i32 : i32, i32
  }
  func.func @transform_1(%arg0: i32) -> (i32, i32) {
    %c0_i32 = arith.constant 0 : i32
    %c0_i32_0 = arith.constant 0 : i32
    %c0_i32_1 = arith.constant 0 : i32
    return %c0_i32, %c0_i32_0 : i32, i32
  }
  func.func @transform_2(%arg0: i32) -> (i32, i32) {
    %c0_i32 = arith.constant 0 : i32
    %c0_i32_0 = arith.constant 0 : i32
    %c0_i32_1 = arith.constant 0 : i32
    return %c0_i32, %c0_i32_0 : i32, i32
  }
  func.func @transform_3(%arg0: i32) -> (i32, i32) {
    %c0_i32 = arith.constant 0 : i32
    %c0_i32_0 = arith.constant 0 : i32
    %c0_i32_1 = arith.constant 0 : i32
    return %c0_i32, %c0_i32_0 : i32, i32
  }
  func.func @transform_4(%arg0: i32) -> (i32, i32) {
    %c0_i32 = arith.constant 0 : i32
    %c0_i32_0 = arith.constant 0 : i32
    %c0_i32_1 = arith.constant 0 : i32
    return %c0_i32, %c0_i32_0 : i32, i32
  }
  func.func @transform_5(%arg0: i32) -> (i32, i32) {
    %c0_i32 = arith.constant 0 : i32
    %c0_i32_0 = arith.constant 0 : i32
    %c0_i32_1 = arith.constant 0 : i32
    return %c0_i32, %c0_i32_0 : i32, i32
  }
  func.func @transform_6(%arg0: i32) -> (i32, i32) {
    %c0_i32 = arith.constant 0 : i32
    %c0_i32_0 = arith.constant 0 : i32
    %c0_i32_1 = arith.constant 0 : i32
    return %c0_i32, %c0_i32_0 : i32, i32
  }
  func.func @transform_7(%arg0: i32) -> (i32, i32) {
    %c0_i32 = arith.constant 0 : i32
    %c0_i32_0 = arith.constant 0 : i32
    %c0_i32_1 = arith.constant 0 : i32
    return %c0_i32, %c0_i32_0 : i32, i32
  }
  func.func @transform_8(%arg0: i32) -> (i32, i32) {
    %c0_i32 = arith.constant 0 : i32
    %c0_i32_0 = arith.constant 0 : i32
    %c0_i32_1 = arith.constant 0 : i32
    return %c0_i32, %c0_i32_0 : i32, i32
  }
  func.func @transform_9(%arg0: i32) -> (i32, i32) {
    %c0_i32 = arith.constant 0 : i32
    %c0_i32_0 = arith.constant 0 : i32
    return %arg0, %c0_i32 : i32, i32
  }
}

</mosaic_0001>

<bundles_post_ra>
// kernel: tpu_custom_call.1
= control target key start
LH: loop header
LB: loop body
LE: loop exit
PB: predicated region body
PF: predicated region fallthrough
CT: control target
= control target key end

     0   :  { %v598_v3 = vmov 0.0|0.0   ;;  %vm599_vm0 = vmmov 0   ;;  %v600_v6 = vmov 0.0   ;;  %s801_s0 = inlined_call_operand.vmem [shape: f32[8,32], index: 0, kind: input, shape index: {}]   ;;  %s802_s1 = inlined_call_operand.vmem [shape: f32[32,128], index: 1, kind: input, shape index: {}]   ;;  %s803_s2 = inlined_call_operand.vmem [shape: f32[1,128], index: 2, kind: input, shape index: {}]   ;;  %s804_s3 = inlined_call_operand.vmem [shape: f32[128,64], index: 3, kind: input, shape index: {}]   ;;  %s805_s4 = inlined_call_operand.vmem [shape: f32[1,64], index: 4, kind: input, shape index: {}]   ;;  %s806_s5 = inlined_call_operand.vmem [shape: f32[64,32], index: 5, kind: input, shape index: {}]   ;;  %s807_s6 = inlined_call_operand.vmem [shape: f32[1,32], index: 6, kind: input, shape index: {}]   ;;  %s808_s7 = inlined_call_operand.vmem [shape: f32[32,128], index: 7, kind: input, shape index: {}]   ;;  %s809_s8 = inlined_call_operand.vmem [shape: f32[1,128], index: 8, kind: input, shape index: {}]   ;;  %s810_s9 = inlined_call_operand.hbm [shape: f32[8,128], index: 9, kind: output, shape index: {}]  }
   0x1   :  { %v34_v0 = vld [vmem:[%s802_s1] sm:$0xff]  ;;  %v35_v1 = vld [vmem:[%s802_s1 + $0x8] sm:$0xff]  ;;  %v36_v2 = vld [vmem:[%s802_s1 + $0x10] sm:$0xff]  ;;  %522 = vmatprep.subr.bf16.mxu0 %v598_v3  ;;  %454 = vmatprep.mubr.msk.f32.mxu0 %vm599_vm0, %v600_v6 }
   0x2   :  { %v523_v4 = vpack.c.bf16 %v35_v1, %v34_v0  ;;  %v37_v5 = vld [vmem:[%s802_s1 + $0x18] sm:$0xff]  ;;  %v120_v7 = vld [vmem:[%s804_s3] sm:$0xff]  ;;  %528 = vmatprep.subr.bf16.mxu1 %v598_v3  ;;  %v121_v8 = vld [vmem:[%s804_s3 + $0x8] sm:$0xff]  ;;  %489 = vmatprep.mubr.msk.f32.mxu1 %vm599_vm0, %v600_v6 }
   0x3   :  { %v122_v9 = vld [vmem:[%s804_s3 + $0x10] sm:$0xff]  ;;  %v123_v10 = vld [vmem:[%s804_s3 + $0x18] sm:$0xff]  ;;  %v526_v11 = vpack.c.bf16 %v37_v5, %v36_v2  ;;  %v529_v12 = vpack.c.bf16 %v121_v8, %v120_v7  ;;  %v124_v14 = vld [vmem:[%s804_s3 + $0x20] sm:$0xff] }
   0x4   :  { %524 = vmatpush3.bf16.msra.mxu0 %v523_v4  ;;  %v532_v13 = vpack.c.bf16 %v123_v10, %v122_v9  ;;  %v125_v15 = vld [vmem:[%s804_s3 + $0x28] sm:$0xff] }
   0x5   :  { %525 = vmatprep.subr.bf16.mxu0 %v598_v3  ;;  %530 = vmatpush3.bf16.msra.mxu1 %v529_v12 }
   0x6   :  { %531 = vmatprep.subr.bf16.mxu1 %v598_v3 }
   0x7   :  { %14 = vsyncpa [#allocation3], 0  ;;  %v33_v16 = vld [vmem:[%s801_s0] sm:$0xff]  ;;  %vm45_vm1 = vcmask 261120   ;;  %v535_v17 = vpack.c.bf16 %v125_v15, %v124_v14  ;;  %v126_v18 = vld [vmem:[%s804_s3 + $0x30] sm:$0xff]  ;;  %vm229_vm2 = vcmask 523264  }
   0x8   :  { %527 = vmatpush3.bf16.msra.mxu0 %v526_v11  ;;  %v127_v19 = vld [vmem:[%s804_s3 + $0x38] sm:$0xff]  ;;  %v128_v21 = vld [vmem:[%s804_s3 + $0x40] sm:$0xff]  ;;  %v129_v22 = vld [vmem:[%s804_s3 + $0x48] sm:$0xff]  ;;  %s601_s11 = smov [#allocation2]  }
   0x9   :  { %552 = vmatprep.subr.bf16.mxu0 %v598_v3  ;;  %533 = vmatpush3.bf16.msra.mxu1 %v532_v13  ;;  %v538_v20 = vpack.c.bf16 %v127_v19, %v126_v18  ;;  %v541_v23 = vpack.c.bf16 %v129_v22, %v128_v21  ;;  %v130_v24 = vld [vmem:[%s804_s3 + $0x50] sm:$0xff]  ;;  %v131_v25 = vld [vmem:[%s804_s3 + $0x58] sm:$0xff]  ;;  %v132_v27 = vld [vmem:[%s804_s3 + $0x60] sm:$0xff]  ;;  %s395_s12 = sshll.u32 %s601_s11, 4  ;;  %s396_s12 = int_to_ptr.vmem [resolvable:$true] %s395_s12 }
   0xa   :  { %534 = vmatprep.subr.bf16.mxu1 %v598_v3  ;;  %v544_v26 = vpack.c.bf16 %v131_v25, %v130_v24  ;;  %v133_v28 = vld [vmem:[%s804_s3 + $0x68] sm:$0xff]  ;;  %v134_v30 = vld [vmem:[%s804_s3 + $0x70] sm:$0xff]  ;;  %v135_v31 = vld [vmem:[%s804_s3 + $0x78] sm:$0xff]  ;;  %p579_p1 = scmp.lt.s32.totalorder %s396_s12, %s396_s12 }
   0xb   :  { %455 = vmatmul.mubr.msk.f32.vlgmr.msra.gmra.mrb[0].mxu0 %vm45_vm1, %v33_v16  ;;  %v547_v29 = vpack.c.bf16 %v133_v28, %v132_v27  ;;  %v550_v32 = vpack.c.bf16 %v135_v31, %v134_v30  ;;  %v214_v33 = vld [vmem:[%s806_s5] sm:$0xff]  ;;  %v215_v34 = vld [vmem:[%s806_s5 + $0x8] sm:$0xff]  ;;  %v216_v35 = vld [vmem:[%s806_s5 + $0x10] sm:$0xff] }
   0xc   :  { %508 = vmatprep.mubr.msk.f32.mxu0 %vm599_vm0, %v600_v6  ;;  %v553_v36 = vpack.c.bf16 %v215_v34, %v214_v33  ;;  %v217_v37 = vld [vmem:[%s806_s5 + $0x18] sm:$0xff]  ;;  %v218_v39 = vld [vmem:[%s806_s5 + $0x20] sm:$0xff]  ;;  %v219_v40 = vld [vmem:[%s806_s5 + $0x28] sm:$0xff] }
   0xd   :  { %536 = vmatpush3.bf16.msra.mxu1 %v535_v17  ;;  %v556_v38 = vpack.c.bf16 %v217_v37, %v216_v35  ;;  %v559_v41 = vpack.c.bf16 %v219_v40, %v218_v39  ;;  %v403_v42 = vld [vmem:[%s803_s2] ss:$0 sm:$0xff]  ;;  %v220_v47 = vld [vmem:[%s806_s5 + $0x30] sm:$0xff]  ;;  %v221_v48 = vld [vmem:[%s806_s5 + $0x38] sm:$0xff] }
   0xe   :  { %537 = vmatprep.subr.bf16.mxu1 %v598_v3  ;;  %554 = vmatpush3.bf16.msra.mxu0 %v553_v36  ;;  %v562_v49 = vpack.c.bf16 %v221_v48, %v220_v47  ;;  %v405_v50 = vld [vmem:[%s805_s4] ss:$0 sm:$0xff]  ;;  %v305_v52 = vld [vmem:[%s808_s7 + $0x8] sm:$0xff]  ;;  %v306_v58 = vld [vmem:[%s808_s7 + $0x10] sm:$0xff] }
   0xf   :  { %555 = vmatprep.subr.bf16.mxu0 %v598_v3  ;;  %v304_v51 = vld [vmem:[%s808_s7] sm:$0xff]  ;;  %v307_v59 = vld [vmem:[%s808_s7 + $0x18] sm:$0xff]  ;;  %s574_s7 = scalar_lea.vmem %s396_s12, 128 }
  0x10   :  { %v565_v56 = vpack.c.bf16 %v305_v52, %v304_v51  ;;  %v568_v60 = vpack.c.bf16 %v307_v59, %v306_v58  ;;  %v406_v61 = vld [vmem:[%s807_s6] ss:$0 sm:$0xff]  ;;  %p575_p0 = scmp.ne.s32.totalorder %s396_s12, %s574_s7  ;;  %p580_p2 = scmp.lt.s32.totalorder %s574_s7, %s574_s7 }
  0x11   :  { %539 = vmatpush3.bf16.msra.mxu1 %v538_v20  ;;  %v408_v2 = vld [vmem:[%s809_s8] ss:$0 sm:$0xff] }
  0x12   :  { %540 = vmatprep.subr.bf16.mxu1 %v598_v3  ;;  %557 = vmatpush3.bf16.msra.mxu0 %v556_v38  ;;  %p581_p3 = por %p580_p2, %p579_p1 }
  0x13   :  { %558 = vmatprep.subr.bf16.mxu0 %v598_v3 }
  0x14   :  { %p582_p4 = pnand %p581_p3, %p575_p0 }
  0x15   :  { %542 = vmatpush3.bf16.msra.mxu1 %v541_v23 }
  0x16   :  { %543 = vmatprep.subr.bf16.mxu1 %v598_v3  ;;  %560 = vmatpush3.bf16.msra.mxu0 %v559_v41 }
  0x17   :  { %561 = vmatprep.subr.bf16.mxu0 %v598_v3 }
  0x19   :  { %545 = vmatpush3.bf16.msra.mxu1 %v544_v26 }
  0x1a   :  { %546 = vmatprep.subr.bf16.mxu1 %v598_v3  ;;  %563 = vmatpush3.bf16.msra.mxu0 %v562_v49 }
  0x1b   :  { %564 = vmatprep.subr.bf16.mxu0 %v598_v3 }
  0x1d   :  { %548 = vmatpush3.bf16.msra.mxu1 %v547_v29 }
  0x1e   :  { %549 = vmatprep.subr.bf16.mxu1 %v598_v3 }
  0x21   :  { %551 = vmatpush3.bf16.msra.mxu1 %v550_v32 }
  0xde   :  { %v115_v43 = vpop.f32.mrb[0].mxu0 }
  0xdf   :  { %v116_v44 = vadd.f32 %v403_v42, %v115_v43  ;;  %v456_v45 = vpop.f32.mrb[1].mxu0 }
  0xe1   :  { %v119_v46 = vmax.f32 %v116_v44, 0.0 }
  0xe3   :  { %490 = vmatmul.mubr.f32.vlgmr.msra.gmra.mrb[0].mxu1 %v119_v46 }
 0x1b6   :  { %v209_v53 = vpop.f32.mrb[0].mxu1 }
 0x1b7   :  { %v210_v54 = vadd.f32 %v405_v50, %v209_v53  ;;  %v491_v55 = vpop.f32.mrb[1].mxu1 }
 0x1b9   :  { %v213_v57 = vmax.f32 %v210_v54, 0.0 }
 0x1bb   :  { %509 = vmatmul.mubr.msk.f32.vlgmr.msra.gmra.mrb[2].mxu0 %vm229_vm2, %v213_v57 }
 0x1bc   :  { %566 = vmatpush3.bf16.msra.mxu0 %v565_v56  ;;  %519 = vmatprep.mubr.msk.f32.mxu0 %vm599_vm0, %v600_v6 }
 0x1bd   :  { %567 = vmatprep.subr.bf16.mxu0 %v598_v3 }
 0x1c0   :  { %569 = vmatpush3.bf16.msra.mxu0 %v568_v60 }
 0x28e   :  { %v299_v62 = vpop.f32.mrb[2].mxu0 }
 0x28f   :  { %v300_v63 = vadd.f32 %v406_v61, %v299_v62  ;;  %v510_v0 = vpop.f32.mrb[3].mxu0 }
 0x291   :  { %v303_v1 = vmax.f32 %v300_v63, 0.0 }
 0x293   :  { %520 = vmatmul.mubr.msk.f32.vlgmr.msra.gmra.mrb[4].mxu0 %vm45_vm1, %v303_v1 }
 0x366   :  { %v384_v3 = vpop.f32.mrb[4].mxu0 }
 0x367   :  { %v385_v4 = vadd.f32 %v408_v2, %v384_v3  ;;  %v521_v5 = vpop.f32.mrb[5].mxu0 }
 0x369   :  { %388 = vst [vmem:[#allocation2] sm:$0xff] %v385_v4 }
 0x36a   :  { %585 = shalt.err (!%p582_p4)
}
 0x36b   :  { %s586_s3 = scalar_lea.hbm %s810_s9, 128 }
 0x36c   :  { %p587_p5 = scmp.ne.s32.totalorder %s810_s9, %s586_s3  ;;  %p590_p6 = scmp.lt.u32.totalorder %s586_s3, %s810_s9 }
 0x36e   :  { %p592_p7 = pnand %p590_p6, %p587_p5 }
 0x370   :  { %595 = shalt.err (!%p592_p7)
}
 0x371   :  { %398 = dma.vmem_to_hbm [thread:$0]  %s396_s12, 128, %s810_s9, [#allocation3]  }
 0x372   :  { %596 = dma.done.wait [#allocation3], 128  }
 0x373   :  { %597 = vsyncadd [#allocation3], 4294967168 }
 0x374   :  { %402 = vsyncpa [#allocation3], 1 }

// kernel: tpu_custom_call.1
= control target key start
LH: loop header
LB: loop body
LE: loop exit
PB: predicated region body
PF: predicated region fallthrough
CT: control target
= control target key end

     0   :  { %v598_v3 = vmov 0.0|0.0   ;;  %vm599_vm0 = vmmov 0   ;;  %v600_v6 = vmov 0.0   ;;  %s801_s0 = inlined_call_operand.vmem [shape: f32[8,32], index: 0, kind: input, shape index: {}]   ;;  %s802_s1 = inlined_call_operand.vmem [shape: f32[32,128], index: 1, kind: input, shape index: {}]   ;;  %s803_s2 = inlined_call_operand.vmem [shape: f32[1,128], index: 2, kind: input, shape index: {}]   ;;  %s804_s3 = inlined_call_operand.vmem [shape: f32[128,64], index: 3, kind: input, shape index: {}]   ;;  %s805_s4 = inlined_call_operand.vmem [shape: f32[1,64], index: 4, kind: input, shape index: {}]   ;;  %s806_s5 = inlined_call_operand.vmem [shape: f32[64,32], index: 5, kind: input, shape index: {}]   ;;  %s807_s6 = inlined_call_operand.vmem [shape: f32[1,32], index: 6, kind: input, shape index: {}]   ;;  %s808_s7 = inlined_call_operand.vmem [shape: f32[32,128], index: 7, kind: input, shape index: {}]   ;;  %s809_s8 = inlined_call_operand.vmem [shape: f32[1,128], index: 8, kind: input, shape index: {}]   ;;  %s810_s9 = inlined_call_operand.hbm [shape: f32[8,128], index: 9, kind: output, shape index: {}]  }
   0x1   :  { %v34_v0 = vld [vmem:[%s802_s1] sm:$0xff]  ;;  %v35_v1 = vld [vmem:[%s802_s1 + $0x8] sm:$0xff]  ;;  %v36_v2 = vld [vmem:[%s802_s1 + $0x10] sm:$0xff]  ;;  %522 = vmatprep.subr.bf16.mxu0 %v598_v3  ;;  %454 = vmatprep.mubr.msk.f32.mxu0 %vm599_vm0, %v600_v6 }
   0x2   :  { %v523_v4 = vpack.c.bf16 %v35_v1, %v34_v0  ;;  %v37_v5 = vld [vmem:[%s802_s1 + $0x18] sm:$0xff]  ;;  %v120_v7 = vld [vmem:[%s804_s3] sm:$0xff]  ;;  %528 = vmatprep.subr.bf16.mxu1 %v598_v3  ;;  %v121_v8 = vld [vmem:[%s804_s3 + $0x8] sm:$0xff]  ;;  %489 = vmatprep.mubr.msk.f32.mxu1 %vm599_vm0, %v600_v6 }
   0x3   :  { %v122_v9 = vld [vmem:[%s804_s3 + $0x10] sm:$0xff]  ;;  %v123_v10 = vld [vmem:[%s804_s3 + $0x18] sm:$0xff]  ;;  %v526_v11 = vpack.c.bf16 %v37_v5, %v36_v2  ;;  %v529_v12 = vpack.c.bf16 %v121_v8, %v120_v7  ;;  %v124_v14 = vld [vmem:[%s804_s3 + $0x20] sm:$0xff] }
   0x4   :  { %524 = vmatpush3.bf16.msra.mxu0 %v523_v4  ;;  %v532_v13 = vpack.c.bf16 %v123_v10, %v122_v9  ;;  %v125_v15 = vld [vmem:[%s804_s3 + $0x28] sm:$0xff] }
   0x5   :  { %525 = vmatprep.subr.bf16.mxu0 %v598_v3  ;;  %530 = vmatpush3.bf16.msra.mxu1 %v529_v12 }
   0x6   :  { %531 = vmatprep.subr.bf16.mxu1 %v598_v3 }
   0x7   :  { %14 = vsyncpa [#allocation3], 0  ;;  %v33_v16 = vld [vmem:[%s801_s0] sm:$0xff]  ;;  %vm45_vm1 = vcmask 261120   ;;  %v535_v17 = vpack.c.bf16 %v125_v15, %v124_v14  ;;  %v126_v18 = vld [vmem:[%s804_s3 + $0x30] sm:$0xff]  ;;  %vm229_vm2 = vcmask 523264  }
   0x8   :  { %527 = vmatpush3.bf16.msra.mxu0 %v526_v11  ;;  %v127_v19 = vld [vmem:[%s804_s3 + $0x38] sm:$0xff]  ;;  %v128_v21 = vld [vmem:[%s804_s3 + $0x40] sm:$0xff]  ;;  %v129_v22 = vld [vmem:[%s804_s3 + $0x48] sm:$0xff]  ;;  %s601_s11 = smov [#allocation2]  }
   0x9   :  { %552 = vmatprep.subr.bf16.mxu0 %v598_v3  ;;  %533 = vmatpush3.bf16.msra.mxu1 %v532_v13  ;;  %v538_v20 = vpack.c.bf16 %v127_v19, %v126_v18  ;;  %v541_v23 = vpack.c.bf16 %v129_v22, %v128_v21  ;;  %v130_v24 = vld [vmem:[%s804_s3 + $0x50] sm:$0xff]  ;;  %v131_v25 = vld [vmem:[%s804_s3 + $0x58] sm:$0xff]  ;;  %v132_v27 = vld [vmem:[%s804_s3 + $0x60] sm:$0xff]  ;;  %s395_s12 = sshll.u32 %s601_s11, 4  ;;  %s396_s12 = int_to_ptr.vmem [resolvable:$true] %s395_s12 }
   0xa   :  { %534 = vmatprep.subr.bf16.mxu1 %v598_v3  ;;  %v544_v26 = vpack.c.bf16 %v131_v25, %v130_v24  ;;  %v133_v28 = vld [vmem:[%s804_s3 + $0x68] sm:$0xff]  ;;  %v134_v30 = vld [vmem:[%s804_s3 + $0x70] sm:$0xff]  ;;  %v135_v31 = vld [vmem:[%s804_s3 + $0x78] sm:$0xff]  ;;  %p579_p1 = scmp.lt.s32.totalorder %s396_s12, %s396_s12 }
   0xb   :  { %455 = vmatmul.mubr.msk.f32.vlgmr.msra.gmra.mrb[0].mxu0 %vm45_vm1, %v33_v16  ;;  %v547_v29 = vpack.c.bf16 %v133_v28, %v132_v27  ;;  %v550_v32 = vpack.c.bf16 %v135_v31, %v134_v30  ;;  %v214_v33 = vld [vmem:[%s806_s5] sm:$0xff]  ;;  %v215_v34 = vld [vmem:[%s806_s5 + $0x8] sm:$0xff]  ;;  %v216_v35 = vld [vmem:[%s806_s5 + $0x10] sm:$0xff] }
   0xc   :  { %508 = vmatprep.mubr.msk.f32.mxu0 %vm599_vm0, %v600_v6  ;;  %v553_v36 = vpack.c.bf16 %v215_v34, %v214_v33  ;;  %v217_v37 = vld [vmem:[%s806_s5 + $0x18] sm:$0xff]  ;;  %v218_v39 = vld [vmem:[%s806_s5 + $0x20] sm:$0xff]  ;;  %v219_v40 = vld [vmem:[%s806_s5 + $0x28] sm:$0xff] }
   0xd   :  { %536 = vmatpush3.bf16.msra.mxu1 %v535_v17  ;;  %v556_v38 = vpack.c.bf16 %v217_v37, %v216_v35  ;;  %v559_v41 = vpack.c.bf16 %v219_v40, %v218_v39  ;;  %v403_v42 = vld [vmem:[%s803_s2] ss:$0 sm:$0xff]  ;;  %v220_v47 = vld [vmem:[%s806_s5 + $0x30] sm:$0xff]  ;;  %v221_v48 = vld [vmem:[%s806_s5 + $0x38] sm:$0xff] }
   0xe   :  { %537 = vmatprep.subr.bf16.mxu1 %v598_v3  ;;  %554 = vmatpush3.bf16.msra.mxu0 %v553_v36  ;;  %v562_v49 = vpack.c.bf16 %v221_v48, %v220_v47  ;;  %v405_v50 = vld [vmem:[%s805_s4] ss:$0 sm:$0xff]  ;;  %v305_v52 = vld [vmem:[%s808_s7 + $0x8] sm:$0xff]  ;;  %v306_v58 = vld [vmem:[%s808_s7 + $0x10] sm:$0xff] }
   0xf   :  { %555 = vmatprep.subr.bf16.mxu0 %v598_v3  ;;  %v304_v51 = vld [vmem:[%s808_s7] sm:$0xff]  ;;  %v307_v59 = vld [vmem:[%s808_s7 + $0x18] sm:$0xff]  ;;  %s574_s7 = scalar_lea.vmem %s396_s12, 128 }
  0x10   :  { %v565_v56 = vpack.c.bf16 %v305_v52, %v304_v51  ;;  %v568_v60 = vpack.c.bf16 %v307_v59, %v306_v58  ;;  %v406_v61 = vld [vmem:[%s807_s6] ss:$0 sm:$0xff]  ;;  %p575_p0 = scmp.ne.s32.totalorder %s396_s12, %s574_s7  ;;  %p580_p2 = scmp.lt.s32.totalorder %s574_s7, %s574_s7 }
  0x11   :  { %539 = vmatpush3.bf16.msra.mxu1 %v538_v20  ;;  %v408_v2 = vld [vmem:[%s809_s8] ss:$0 sm:$0xff] }
  0x12   :  { %540 = vmatprep.subr.bf16.mxu1 %v598_v3  ;;  %557 = vmatpush3.bf16.msra.mxu0 %v556_v38  ;;  %p581_p3 = por %p580_p2, %p579_p1 }
  0x13   :  { %558 = vmatprep.subr.bf16.mxu0 %v598_v3 }
  0x14   :  { %p582_p4 = pnand %p581_p3, %p575_p0 }
  0x15   :  { %542 = vmatpush3.bf16.msra.mxu1 %v541_v23 }
  0x16   :  { %543 = vmatprep.subr.bf16.mxu1 %v598_v3  ;;  %560 = vmatpush3.bf16.msra.mxu0 %v559_v41 }
  0x17   :  { %561 = vmatprep.subr.bf16.mxu0 %v598_v3 }
  0x19   :  { %545 = vmatpush3.bf16.msra.mxu1 %v544_v26 }
  0x1a   :  { %546 = vmatprep.subr.bf16.mxu1 %v598_v3  ;;  %563 = vmatpush3.bf16.msra.mxu0 %v562_v49 }
  0x1b   :  { %564 = vmatprep.subr.bf16.mxu0 %v598_v3 }
  0x1d   :  { %548 = vmatpush3.bf16.msra.mxu1 %v547_v29 }
  0x1e   :  { %549 = vmatprep.subr.bf16.mxu1 %v598_v3 }
  0x21   :  { %551 = vmatpush3.bf16.msra.mxu1 %v550_v32 }
  0xde   :  { %v115_v43 = vpop.f32.mrb[0].mxu0 }
  0xdf   :  { %v116_v44 = vadd.f32 %v403_v42, %v115_v43  ;;  %v456_v45 = vpop.f32.mrb[1].mxu0 }
  0xe1   :  { %v119_v46 = vmax.f32 %v116_v44, 0.0 }
  0xe3   :  { %490 = vmatmul.mubr.f32.vlgmr.msra.gmra.mrb[0].mxu1 %v119_v46 }
 0x1b6   :  { %v209_v53 = vpop.f32.mrb[0].mxu1 }
 0x1b7   :  { %v210_v54 = vadd.f32 %v405_v50, %v209_v53  ;;  %v491_v55 = vpop.f32.mrb[1].mxu1 }
 0x1b9   :  { %v213_v57 = vmax.f32 %v210_v54, 0.0 }
 0x1bb   :  { %509 = vmatmul.mubr.msk.f32.vlgmr.msra.gmra.mrb[2].mxu0 %vm229_vm2, %v213_v57 }
 0x1bc   :  { %566 = vmatpush3.bf16.msra.mxu0 %v565_v56  ;;  %519 = vmatprep.mubr.msk.f32.mxu0 %vm599_vm0, %v600_v6 }
 0x1bd   :  { %567 = vmatprep.subr.bf16.mxu0 %v598_v3 }
 0x1c0   :  { %569 = vmatpush3.bf16.msra.mxu0 %v568_v60 }
 0x28e   :  { %v299_v62 = vpop.f32.mrb[2].mxu0 }
 0x28f   :  { %v300_v63 = vadd.f32 %v406_v61, %v299_v62  ;;  %v510_v0 = vpop.f32.mrb[3].mxu0 }
 0x291   :  { %v303_v1 = vmax.f32 %v300_v63, 0.0 }
 0x293   :  { %520 = vmatmul.mubr.msk.f32.vlgmr.msra.gmra.mrb[4].mxu0 %vm45_vm1, %v303_v1 }
 0x366   :  { %v384_v3 = vpop.f32.mrb[4].mxu0 }
 0x367   :  { %v385_v4 = vadd.f32 %v408_v2, %v384_v3  ;;  %v521_v5 = vpop.f32.mrb[5].mxu0 }
 0x369   :  { %388 = vst [vmem:[#allocation2] sm:$0xff] %v385_v4 }
 0x36a   :  { %585 = shalt.err (!%p582_p4)
}
 0x36b   :  { %s586_s3 = scalar_lea.hbm %s810_s9, 128 }
 0x36c   :  { %p587_p5 = scmp.ne.s32.totalorder %s810_s9, %s586_s3  ;;  %p590_p6 = scmp.lt.u32.totalorder %s586_s3, %s810_s9 }
 0x36e   :  { %p592_p7 = pnand %p590_p6, %p587_p5 }
 0x370   :  { %595 = shalt.err (!%p592_p7)
}
 0x371   :  { %398 = dma.vmem_to_hbm [thread:$0]  %s396_s12, 128, %s810_s9, [#allocation3]  }
 0x372   :  { %596 = dma.done.wait [#allocation3], 128  }
 0x373   :  { %597 = vsyncadd [#allocation3], 4294967168 }
 0x374   :  { %402 = vsyncpa [#allocation3], 1 }

</bundles_post_ra>
